<compile_context>
chip_gen: v6e
topology: v6e:2x2x1
jax: 0.10.0
libtpu: 0.0.40
codegen_flags: <defaults>
</compile_context>

<pallas_src>
import jax
import jax.numpy as jnp
from jax.experimental import pallas as pl
from jax.experimental.pallas import tpu as pltpu

_VMEM = pltpu.MemorySpace.VMEM
_BN_EPS = 1e-5


# ---------------------------------------------------------------------------
# Hardware-aware budgets
# ---------------------------------------------------------------------------
def _vmem_capacity_bytes() -> int:
    try:
        info = pltpu.get_tpu_info()
        return int(getattr(info, "vmem_capacity_bytes", 128 * 1024 * 1024))
    except Exception:
        return 128 * 1024 * 1024


def _budgets():
    """(per-tile byte budget, scoped-VMEM limit) per TPU generation."""
    cap = _vmem_capacity_bytes()
    if cap <= 64 * 1024 * 1024:                 # v7x-class: 64 MiB VMEM per TC
        return 4 * 1024 * 1024, 48 * 1024 * 1024
    return 8 * 1024 * 1024, 96 * 1024 * 1024    # v5e / v6e: 128 MiB VMEM


def _plan_tiles(B: int, C: int, HW: int, dtype_bytes: int, budget: int):
    """Pick (tile_c, tile_hw) obeying the (8,128) layout rule and the budget."""
    hw_ru = ((HW + 127) // 128) * 128

    tile_c = C
    if C % 8 == 0:
        if B == 1 and C >= 16:
            # give megacore >= 2 parallel channel blocks even for batch 1
            tile_c = max(8, ((C // 2 + 7) // 8) * 8)
        # for very wide C, shrink the channel block so the lane extent can stay
        # reasonably large (>= 512 lanes when HW allows) within the budget
        min_lanes = min(hw_ru, 512)
        cap = (budget // (dtype_bytes * min_lanes)) // 8 * 8
        if cap >= 8:
            tile_c = min(tile_c, cap)

    tile_hw = (budget // (dtype_bytes * tile_c)) // 128 * 128
    tile_hw = max(128, min(tile_hw, hw_ru))
    if tile_hw >= HW:
        tile_hw = HW                       # single full-extent block along HW
    return int(tile_c), int(tile_hw)


# ---------------------------------------------------------------------------
# Pass 1 (tiled path): global average pool, reduction over HW (last grid axis)
# ---------------------------------------------------------------------------
def _make_pool_kernel(hw_total: int, tile_hw: int):
    inv_hw = 1.0 / float(hw_total)
    needs_mask = (hw_total % tile_hw) != 0

    def pool_kernel(x_ref, ysum_ref):
        # x_ref: (1, tile_c, tile_hw) native dtype ; ysum_ref: (1, tile_c, 1)
        # f32, resident across the HW axis (same block index for every k).
        k = pl.program_id(2)
        nk = pl.num_programs(2)

        @pl.when(k == 0)
        def _init():
            ysum_ref[...] = jnp.zeros_like(ysum_ref)

        # load in native dtype, accumulate in f32 (v5e has no bf16 VALU; the
        # converts are filler under DMA slack)
        x = x_ref[...].astype(jnp.float32)

        if needs_mask:
            # Only the tail tile pays for the iota/compare/select.
            @pl.when(k == nk - 1)
            def _tail():
                lane = jax.lax.broadcasted_iota(jnp.int32, x.shape, 2)
                valid = (k * tile_hw + lane) < hw_total
                ysum_ref[...] += jnp.sum(jnp.where(valid, x, 0.0),
                                         axis=2, keepdims=True)

            @pl.when(k != nk - 1)
            def _body():
                ysum_ref[...] += jnp.sum(x, axis=2, keepdims=True)
        else:
            ysum_ref[...] += jnp.sum(x, axis=2, keepdims=True)

        @pl.when(k == nk - 1)
        def _finalize():
            ysum_ref[...] = ysum_ref[...] * inv_hw      # mean = sum / HW

    return pool_kernel


# ---------------------------------------------------------------------------
# Pass 3 (tiled path): out = x * s  (per-channel scale), native dtype store
# ---------------------------------------------------------------------------
def _scale_kernel(x_ref, s_ref, out_ref):
    # x_ref: (1, tile_c, tile_hw) native dtype ; s_ref: (1, tile_c, 1) f32
    out_ref[...] = (x_ref[...].astype(jnp.float32) * s_ref[...]).astype(out_ref.dtype)


# ---------------------------------------------------------------------------
# Fused single-kernel fast path: x resident in VMEM -> pool -> MLP -> scale
# ---------------------------------------------------------------------------
def _make_fused_kernel(hw_total: int):
    inv_hw = 1.0 / float(hw_total)

    def fused_kernel(x_ref, w1t_ref, b1_ref, gamma_ref, beta_ref,
                     w2t_ref, b2_ref, out_ref):
        xf = x_ref[...].astype(jnp.float32)                 # (B, C, HW)
        y = jnp.sum(xf, axis=2) * inv_hw                    # (B, C) pooled mean

        h = jnp.dot(y, w1t_ref[...],
                    preferred_element_type=jnp.float32) + b1_ref[...]   # (B, Cr)
        # BatchNorm1d, training mode: full-batch mean / biased variance.
        mu = jnp.mean(h, axis=0, keepdims=True)
        var = jnp.mean((h - mu) ** 2, axis=0, keepdims=True)
        h = (h - mu) * jax.lax.rsqrt(var + _BN_EPS)
        h = h * gamma_ref[...] + beta_ref[...]
        h = jnp.maximum(h, 0.0)                                          # ReLU
        s = jnp.dot(h, w2t_ref[...],
                    preferred_element_type=jnp.float32) + b2_ref[...]    # (B, C)

        out_ref[...] = (xf * s[:, :, None]).astype(out_ref.dtype)

    return fused_kernel


# ---------------------------------------------------------------------------
# Excitation MLP (tiled path): a few KB of work -> plain jnp / XLA, no kernel.
# ---------------------------------------------------------------------------
def _excitation(y, w1t, b1, gamma, beta, w2t, b2):
    h = jnp.dot(y, w1t, preferred_element_type=jnp.float32) + b1
    mu = jnp.mean(h, axis=0, keepdims=True)
    var = jnp.mean((h - mu) ** 2, axis=0, keepdims=True)
    h = (h - mu) * jax.lax.rsqrt(var + _BN_EPS)
    h = h * gamma + beta
    h = jnp.maximum(h, 0.0)
    return jnp.dot(h, w2t, preferred_element_type=jnp.float32) + b2


# ---------------------------------------------------------------------------
# Wrapper
# ---------------------------------------------------------------------------
def se_attention(x_nchw, w1, b1, gamma, beta, w2, b2, *, force_tiled: bool = False):
    """x_nchw: (B, C, H, W), any float dtype (kept native end-to-end).
    nn.Linear convention: w1: (Cr, C), b1: (Cr,), w2: (C, Cr), b2: (C,);
    BatchNorm1d gamma/beta: (Cr,)."""
    B, C, H, W = x_nchw.shape
    Cr = w1.shape[0]
    HW = H * W
    dtype = x_nchw.dtype
    dtype_bytes = jnp.dtype(dtype).itemsize

    x3 = x_nchw.reshape(B, C, HW)            # native dtype — no f32 up-cast

    tile_budget, vmem_limit = _budgets()

    # Tiny weights, prepared once (XLA fuses the transposes).
    w1t = jnp.transpose(w1).astype(jnp.float32)          # (C, Cr)
    w2t = jnp.transpose(w2).astype(jnp.float32)          # (Cr, C)
    b1_r = b1.reshape(1, Cr).astype(jnp.float32)
    b2_r = b2.reshape(1, C).astype(jnp.float32)
    gamma_r = gamma.reshape(1, Cr).astype(jnp.float32)
    beta_r = beta.reshape(1, Cr).astype(jnp.float32)

    # ---- fused fast path: whole x (in + out + f32 temp) fits in VMEM -------
    x_f32_bytes = B * C * HW * 4
    fused_ok = (3 * x_f32_bytes + 2 * 1024 * 1024) <= (3 * vmem_limit) // 4

    if fused_ok and not force_tiled:
        out3 = pl.pallas_call(
            _make_fused_kernel(HW),
            out_shape=jax.ShapeDtypeStruct((B, C, HW), dtype),
            in_specs=[pl.BlockSpec(memory_space=_VMEM)] * 7,
            out_specs=pl.BlockSpec(memory_space=_VMEM),
            compiler_params=pltpu.CompilerParams(vmem_limit_bytes=vmem_limit),
            cost_estimate=pl.CostEstimate(
                flops=3 * B * C * HW + 4 * B * C * Cr,
                transcendentals=0,
                bytes_accessed=2 * B * C * HW * dtype_bytes),
        )(x3, w1t, b1_r, gamma_r, beta_r, w2t, b2_r)
        return out3.reshape(B, C, H, W)

    # ---- streaming 3-pass path ----------------------------------------------
    tile_c, tile_hw = _plan_tiles(B, C, HW, dtype_bytes, tile_budget)
    n_c = pl.cdiv(C, tile_c)
    n_hw = pl.cdiv(HW, tile_hw)

    # pass 1: global average pool -> (B, C, 1) f32
    y3 = pl.pallas_call(
        _make_pool_kernel(HW, tile_hw),
        out_shape=jax.ShapeDtypeStruct((B, C, 1), jnp.float32),
        grid_spec=pltpu.PrefetchScalarGridSpec(
            num_scalar_prefetch=0,
            grid=(B, n_c, n_hw),
            in_specs=[pl.BlockSpec((1, tile_c, tile_hw),
                                   lambda b, c, k: (b, c, k))],
            out_specs=pl.BlockSpec((1, tile_c, 1), lambda b, c, k: (b, c, 0)),
        ),
        compiler_params=pltpu.CompilerParams(
            dimension_semantics=("parallel", "parallel", "arbitrary"),
            vmem_limit_bytes=vmem_limit),
        cost_estimate=pl.CostEstimate(
            flops=B * C * HW, transcendentals=0,
            bytes_accessed=B * C * HW * dtype_bytes + B * C * 4),
    )(x3)

    # pass 2: excitation MLP on (B, C) — plain XLA (a dedicated pallas_call
    # would only add launch overhead + an HBM round trip for a few KB of work)
    y = y3.reshape(B, C)
    s = _excitation(y, w1t, b1_r, gamma_r, beta_r, w2t, b2_r)    # (B, C) f32
    s3 = s.reshape(B, C, 1)

    # pass 3: out = x * s, native-dtype stream
    out3 = pl.pallas_call(
        _scale_kernel,
        out_shape=jax.ShapeDtypeStruct((B, C, HW), dtype),
        grid_spec=pltpu.PrefetchScalarGridSpec(
            num_scalar_prefetch=0,
            grid=(B, n_c, n_hw),
            in_specs=[pl.BlockSpec((1, tile_c, tile_hw),
                                   lambda b, c, k: (b, c, k)),
                      pl.BlockSpec((1, tile_c, 1), lambda b, c, k: (b, c, 0))],
            out_specs=pl.BlockSpec((1, tile_c, tile_hw),
                                   lambda b, c, k: (b, c, k)),
        ),
        compiler_params=pltpu.CompilerParams(
            dimension_semantics=("parallel", "parallel", "parallel"),
            vmem_limit_bytes=vmem_limit),
        cost_estimate=pl.CostEstimate(
            flops=B * C * HW, transcendentals=0,
            bytes_accessed=2 * B * C * HW * dtype_bytes + B * C * 4),
    )(x3, s3)

    return out3.reshape(B, C, H, W)


# ---------------------------------------------------------------------------
# Pure-JAX reference (mirrors the PyTorch forward; training-mode BN, no sigmoid)
# ---------------------------------------------------------------------------
def _reference(x, w1, b1, gamma, beta, w2, b2):
    y = jnp.mean(x, axis=(2, 3))                           # (B, C)
    h = y @ w1.T + b1
    mu = jnp.mean(h, axis=0, keepdims=True)
    var = jnp.mean((h - mu) ** 2, axis=0, keepdims=True)
    h = (h - mu) / jnp.sqrt(var + _BN_EPS) * gamma + beta
    h = jnp.maximum(h, 0.0)
    s = h @ w2.T + b2
    return x * s[:, :, None, None]


if __name__ == "__main__":
    B, C, H, W = 2, 4, 16, 16
    reduction = 2
    Cr = C // reduction

    key = jax.random.PRNGKey(0)
    k_x, k_w1, k_b1, k_w2, k_b2 = jax.random.split(key, 5)

    x = jax.random.normal(k_x, (B, C, H, W), dtype=jnp.float32)

    lim1 = 1.0 / jnp.sqrt(C)
    w1 = jax.random.uniform(k_w1, (Cr, C), minval=-lim1, maxval=lim1,
                            dtype=jnp.float32)
    b1 = jax.random.uniform(k_b1, (Cr,), minval=-lim1, maxval=lim1,
                            dtype=jnp.float32)
    lim2 = 1.0 / jnp.sqrt(Cr)
    w2 = jax.random.uniform(k_w2, (C, Cr), minval=-lim2, maxval=lim2,
                            dtype=jnp.float32)
    b2 = jax.random.uniform(k_b2, (C,), minval=-lim2, maxval=lim2,
                            dtype=jnp.float32)
    gamma = jnp.ones((Cr,), dtype=jnp.float32)   # BatchNorm1d default weight
    beta = jnp.zeros((Cr,), dtype=jnp.float32)   # BatchNorm1d default bias

    ref = _reference(x, w1, b1, gamma, beta, w2, b2)

    # fused VMEM-resident path (auto-dispatched for this small shape)
    out_fused = jax.block_until_ready(
        se_attention(x, w1, b1, gamma, beta, w2, b2))
    assert out_fused.shape == (B, C, H, W)
    assert jnp.allclose(out_fused, ref, atol=1e-5, rtol=1e-5), "fused mismatch"

    # streaming 3-pass path (what large feature maps dispatch to)
    out_tiled = jax.block_until_ready(
        se_attention(x, w1, b1, gamma, beta, w2, b2, force_tiled=True))
    assert jnp.allclose(out_tiled, ref, atol=1e-5, rtol=1e-5), "tiled mismatch"

    # native-dtype streaming: bf16 in / bf16 out (no f32 up-cast of x)
    x_bf16 = x.astype(jnp.bfloat16)
    ref_bf = _reference(x_bf16.astype(jnp.float32), w1, b1, gamma, beta, w2, b2)
    out_bf_fused = jax.block_until_ready(
        se_attention(x_bf16, w1, b1, gamma, beta, w2, b2))
    out_bf_tiled = jax.block_until_ready(
        se_attention(x_bf16, w1, b1, gamma, beta, w2, b2, force_tiled=True))
    assert out_bf_fused.dtype == jnp.bfloat16
    assert out_bf_tiled.dtype == jnp.bfloat16
    assert jnp.allclose(out_bf_fused.astype(jnp.float32), ref_bf,
                        atol=5e-2, rtol=5e-2), "fused bf16 mismatch"
    assert jnp.allclose(out_bf_tiled.astype(jnp.float32), ref_bf,
                        atol=5e-2, rtol=5e-2), "tiled bf16 mismatch"

    print("KERNEL_OK")
</pallas_src>

<mosaic_0001>
module attributes {stable_mosaic.version = 11 : i64} {
  func.func @fused_kernel(%arg0: memref<2x4x256xf32, #tpu.memory_space<vmem>>, %arg1: memref<4x2xf32, #tpu.memory_space<vmem>>, %arg2: memref<1x2xf32, #tpu.memory_space<vmem>>, %arg3: memref<1x2xf32, #tpu.memory_space<vmem>>, %arg4: memref<1x2xf32, #tpu.memory_space<vmem>>, %arg5: memref<2x4xf32, #tpu.memory_space<vmem>>, %arg6: memref<1x4xf32, #tpu.memory_space<vmem>>, %arg7: memref<2x4x256xf32, #tpu.memory_space<vmem>>) attributes {dimension_semantics = [], scalar_prefetch = 0 : i64, scratch_operands = 0 : i64, tpu.core_type = #tpu.core_type<tc>} {
    %c0 = arith.constant 0 : index
    %c0_0 = arith.constant 0 : index
    %c0_1 = arith.constant 0 : index
    %0 = vector.load %arg0[%c0, %c0_0, %c0_1] : memref<2x4x256xf32, #tpu.memory_space<vmem>>, vector<2x4x256xf32>
    %cst = arith.constant dense<0.000000e+00> : vector<2x4xf32>
    %1 = vector.multi_reduction <add>, %0, %cst [2] : vector<2x4x256xf32> to vector<2x4xf32>
    %cst_2 = arith.constant 3.906250e-03 : f32
    %2 = vector.broadcast %cst_2 : f32 to vector<2x4xf32>
    %3 = arith.mulf %1, %2 : vector<2x4xf32>
    %c0_3 = arith.constant 0 : index
    %c0_4 = arith.constant 0 : index
    %4 = vector.load %arg1[%c0_3, %c0_4] : memref<4x2xf32, #tpu.memory_space<vmem>>, vector<4x2xf32>
    %cst_5 = arith.constant dense<0.000000e+00> : vector<2x2xf32>
    %5 = tpu.matmul %3, %4, %cst_5 {dimension_numbers = #tpu.dot_dimension_numbers<[1], [0], [0], [1], [0, 0, 1, 1], [], []>} : vector<2x4xf32>, vector<4x2xf32>, vector<2x2xf32> -> vector<2x2xf32>
    %c0_6 = arith.constant 0 : index
    %c0_7 = arith.constant 0 : index
    %6 = vector.load %arg2[%c0_6, %c0_7] : memref<1x2xf32, #tpu.memory_space<vmem>>, vector<1x2xf32>
    %7 = vector.broadcast %6 : vector<1x2xf32> to vector<2x2xf32>
    %8 = arith.addf %5, %7 : vector<2x2xf32>
    %cst_8 = arith.constant dense<0.000000e+00> : vector<2xf32>
    %9 = vector.multi_reduction <add>, %8, %cst_8 [0] : vector<2x2xf32> to vector<2xf32>
    %10 = vector.shape_cast %9 : vector<2xf32> to vector<1x2xf32>
    %cst_9 = arith.constant 2.000000e+00 : f32
    %11 = vector.broadcast %cst_9 : f32 to vector<1x2xf32>
    %12 = arith.divf %10, %11 : vector<1x2xf32>
    %13 = vector.broadcast %12 : vector<1x2xf32> to vector<2x2xf32>
    %14 = arith.subf %8, %13 : vector<2x2xf32>
    %15 = arith.mulf %14, %14 : vector<2x2xf32>
    %cst_10 = arith.constant dense<0.000000e+00> : vector<2xf32>
    %16 = vector.multi_reduction <add>, %15, %cst_10 [0] : vector<2x2xf32> to vector<2xf32>
    %17 = vector.shape_cast %16 : vector<2xf32> to vector<1x2xf32>
    %cst_11 = arith.constant 2.000000e+00 : f32
    %18 = vector.broadcast %cst_11 : f32 to vector<1x2xf32>
    %19 = arith.divf %17, %18 : vector<1x2xf32>
    %20 = vector.broadcast %12 : vector<1x2xf32> to vector<2x2xf32>
    %21 = arith.subf %8, %20 : vector<2x2xf32>
    %cst_12 = arith.constant 9.99999974E-6 : f32
    %22 = vector.broadcast %cst_12 : f32 to vector<1x2xf32>
    %23 = arith.addf %19, %22 : vector<1x2xf32>
    %24 = math.rsqrt %23 : vector<1x2xf32>
    %25 = vector.broadcast %24 : vector<1x2xf32> to vector<2x2xf32>
    %26 = arith.mulf %21, %25 : vector<2x2xf32>
    %c0_13 = arith.constant 0 : index
    %c0_14 = arith.constant 0 : index
    %27 = vector.load %arg3[%c0_13, %c0_14] : memref<1x2xf32, #tpu.memory_space<vmem>>, vector<1x2xf32>
    %28 = vector.broadcast %27 : vector<1x2xf32> to vector<2x2xf32>
    %29 = arith.mulf %26, %28 : vector<2x2xf32>
    %c0_15 = arith.constant 0 : index
    %c0_16 = arith.constant 0 : index
    %30 = vector.load %arg4[%c0_15, %c0_16] : memref<1x2xf32, #tpu.memory_space<vmem>>, vector<1x2xf32>
    %31 = vector.broadcast %30 : vector<1x2xf32> to vector<2x2xf32>
    %32 = arith.addf %29, %31 : vector<2x2xf32>
    %cst_17 = arith.constant 0.000000e+00 : f32
    %33 = vector.broadcast %cst_17 : f32 to vector<2x2xf32>
    %34 = arith.maximumf %32, %33 : vector<2x2xf32>
    %c0_18 = arith.constant 0 : index
    %c0_19 = arith.constant 0 : index
    %35 = vector.load %arg5[%c0_18, %c0_19] : memref<2x4xf32, #tpu.memory_space<vmem>>, vector<2x4xf32>
    %cst_20 = arith.constant dense<0.000000e+00> : vector<2x4xf32>
    %36 = tpu.matmul %34, %35, %cst_20 {dimension_numbers = #tpu.dot_dimension_numbers<[1], [0], [0], [1], [0, 0, 1, 1], [], []>} : vector<2x2xf32>, vector<2x4xf32>, vector<2x4xf32> -> vector<2x4xf32>
    %c0_21 = arith.constant 0 : index
    %c0_22 = arith.constant 0 : index
    %37 = vector.load %arg6[%c0_21, %c0_22] : memref<1x4xf32, #tpu.memory_space<vmem>>, vector<1x4xf32>
    %38 = vector.broadcast %37 : vector<1x4xf32> to vector<2x4xf32>
    %39 = arith.addf %36, %38 : vector<2x4xf32>
    %40 = vector.shape_cast %39 : vector<2x4xf32> to vector<2x4x1xf32>
    %41 = vector.broadcast %40 : vector<2x4x1xf32> to vector<2x4x256xf32>
    %42 = arith.mulf %0, %41 : vector<2x4x256xf32>
    %c0_23 = arith.constant 0 : index
    %c0_24 = arith.constant 0 : index
    %c0_25 = arith.constant 0 : index
    %43 = vector.load %arg7[%c0_23, %c0_24, %c0_25] : memref<2x4x256xf32, #tpu.memory_space<vmem>>, vector<2x4x256xf32>
    tpu.vector_store %arg7[%c0_23, %c0_24, %c0_25], %42 {strides = array<i32>} : memref<2x4x256xf32, #tpu.memory_space<vmem>>, vector<2x4x256xf32>,
    return
  }
}

</mosaic_0001>

<bundles_post_ra>
// kernel: tpu_custom_call.1
= control target key start
LH: loop header
LB: loop body
LE: loop exit
PB: predicated region body
PF: predicated region fallthrough
CT: control target
= control target key end

     0   :  { %12 = vsyncpa [#allocation3], 0  ;;  %s510_s0 = inlined_call_operand.hbm [shape: f32[2,4,256], index: 0, kind: input, shape index: {}]   ;;  %s511_s1 = inlined_call_operand.vmem [shape: f32[4,2], index: 1, kind: input, shape index: {}]   ;;  %s512_s2 = inlined_call_operand.vmem [shape: f32[1,2], index: 2, kind: input, shape index: {}]   ;;  %s513_s3 = inlined_call_operand.vmem [shape: f32[1,2], index: 3, kind: input, shape index: {}]   ;;  %s514_s4 = inlined_call_operand.vmem [shape: f32[1,2], index: 4, kind: input, shape index: {}]   ;;  %s515_s5 = inlined_call_operand.vmem [shape: f32[2,4], index: 5, kind: input, shape index: {}]   ;;  %s516_s6 = inlined_call_operand.vmem [shape: f32[1,4], index: 6, kind: input, shape index: {}]   ;;  %s517_s7 = inlined_call_operand.hbm [shape: f32[2,4,256], index: 7, kind: output, shape index: {}]  }
   0x1   :  { %13 = vsyncpa [#allocation4], 0  ;;  %s416_s24 = smov [#allocation2]  }
   0x2   :  { %s19_s25 = sshll.u32 %s416_s24, 4  ;;  %s20_s25 = int_to_ptr.vmem [resolvable:$true] %s19_s25 }
   0x3   :  { %s380_s26 = scalar_lea.vmem %s20_s25, 256  ;;  %p385_p1 = scmp.lt.s32.totalorder %s20_s25, %s20_s25 }
   0x4   :  { %p381_p0 = scmp.ne.s32.totalorder %s20_s25, %s380_s26  ;;  %p386_p2 = scmp.lt.s32.totalorder %s380_s26, %s380_s26 }
   0x6   :  { %p387_p3 = por %p386_p2, %p385_p1 }
   0x8   :  { %p388_p4 = pnand %p387_p3, %p381_p0 }
   0xa   :  { %391 = shalt.err (!%p388_p4)
}
   0xb   :  { %s417_s27 = smov 128   ;;  %s418_s28 = smov 8  }
   0xc   :  { %25 = dma.hbm_to_vmem [thread:$0]  %s510_s0, 256, %s20_s25, [#allocation3], %s417_s27, %s417_s27, %s418_s28  }
   0xd   :  { %412 = dma.done.wait [#allocation3], 256  }
   0xe   :  { %413 = vsyncadd [#allocation3], 4294967040  ;;  %vm49_vm0 = vcmask 1043456   ;;  %v469_v0 = vld [vmem:[#allocation2] sm:$0xff]  ;;  %v471_v1 = vld [vmem:[#allocation2 + $0x8] sm:$0xff]  ;;  %v419_v11 = vmov 0.0   ;;  %v72_v12 = vlaneseq }
   0xf   :  { %v45_v2 = vcombine.high %v469_v0, %v469_v0  ;;  %v50_v3 = vsel %vm49_vm0, %v469_v0, 0.0  ;;  %v46_v4 = vcombine.high %v471_v1, %v471_v1  ;;  %v55_v6 = vsel %vm49_vm0, %v471_v1, 0.0  ;;  %v62_v10 = vld [vmem:[%s511_s1] sm:$0xf]  ;;  %351 = vmatprep.subr.mxu0 %v419_v11  ;;  %356 = vmatprep.subr.mxu1 %v419_v11 }
  0x10   :  { %vm420_vm1 = vmmov 0   ;;  %352 = vmatpush3.msk.msra.mxu0 %vm49_vm0, %v62_v10  ;;  %v73_v13 = vand.u32 127, %v72_v12  ;;  %v75_v14 = vshrl.u32 %v72_v12, 7  ;;  %vm82_vm2 = vcmask 1041409   ;;  %v200_v23 = vld [vmem:[%s515_s5] sm:$0x3] }
  0x11   :  { %v51_v5 = vsel %vm49_vm0, %v45_v2, 0.0  ;;  %v56_v7 = vsel %vm49_vm0, %v46_v4, 0.0  ;;  %353 = vmatprep.mubr.msk.f32.mxu0 %vm420_vm1, %v419_v11  ;;  %358 = vmatprep.mubr.msk.f32.mxu1 %vm420_vm1, %v419_v11  ;;  %vm84_vm3 = vcmask 31744   ;;  %vm212_vm4 = vcmask 1041408   ;;  %v339_v24 = vld [vmem:[%s512_s2] ss:$0 sm:$0xff] }
  0x12   :  { %v52_v8 = vadd.f32 %v51_v5, %v50_v3  ;;  %v57_v9 = vadd.f32 %v56_v7, %v55_v6  ;;  %v76_v16 = vsub.s32 %v73_v13, %v75_v14  ;;  %357 = vmatpush3.msk.msra.mxu1 %vm212_vm4, %v200_v23  ;;  %vm160_vm5 = vcmask 9216   ;;  %v342_v48 = vld [vmem:[%s513_s3] ss:$0 sm:$0xff]  ;;  %s422_s3 = smov [#allocation5]  }
  0x13   :  { %v343_v50 = vld [vmem:[%s514_s4] ss:$0 sm:$0xff]  ;;  %vm208_vm6 = vcmask 15360   ;;  %v288_v55 = vsub.s32 0, %v75_v14  ;;  %v295_v60 = vsub.s32 1, %v75_v14  ;;  %s327_s4 = sshll.u32 %s422_s3, 4  ;;  %s328_s4 = int_to_ptr.vmem [resolvable:$true] %s327_s4 }
  0x14   :  { %53 = vadd.xlane.f32.xlu0 %v52_v8  ;;  %v344_v54 = vld [vmem:[%s516_s6] ss:$0 sm:$0xff]  ;;  %v421_v62 = vmov 839922192   ;;  %s392_s6 = scalar_lea.vmem %s328_s4, 256  ;;  %p397_p6 = scmp.lt.s32.totalorder %s328_s4, %s328_s4 }
  0x15   :  { %v303_v63 = vunpack.c.l.s4 %v421_v62  ;;  %p393_p5 = scmp.ne.s32.totalorder %s328_s4, %s392_s6  ;;  %p398_p7 = scmp.lt.s32.totalorder %s392_s6, %s392_s6 }
  0x17   :  { %v304_v2 = vunpack.c.0.s8 %v303_v63  ;;  %p399_p8 = por %p398_p7, %p397_p6 }
  0x18   :  { %58 = vadd.xlane.f32.xlu0 %v57_v9 }
  0x19   :  { %v307_v3 = vsub.s32 %v304_v2, %v75_v14  ;;  %p400_p9 = pnand %p399_p8, %p393_p5 }
  0x9d   :  { %v54_v15 = vpop.xlane.xlu0 %53 }
  0x9e   :  { %v60_v17 = vmul.f32 0.00390625, %v54_v15 }
  0xa0   :  { %v77_v20 = vrot.slane %v60_v17, %v76_v16 }
  0xa1   :  { %v59_v18 = vpop.xlane.xlu0 %58 }
  0xa2   :  { %v61_v19 = vmul.f32 0.00390625, %v59_v18 }
  0xa4   :  { %v81_v21 = vrot.slane %v61_v19, %v76_v16 }
  0xa6   :  { %v83_v22 = vsel %vm82_vm2, %v81_v21, %v77_v20 }
  0xa7   :  { %354 = vmatmul.mubr.msk.f32.vlgmr.msra.gmra.mxu0 %vm84_vm3, %v83_v22 }
 0x167   :  { %v156_v25 = vpop.f32.mrf.mxu0 }
 0x168   :  { %v157_v26 = vadd.f32 %v339_v24, %v156_v25 }
 0x169   :  { %v355_v27 = vpop.f32.mrf.mxu0 }
 0x16a   :  { %v161_v28 = vsel %vm160_vm5, %v157_v26, 0.0 }
 0x16b   :  { %v162_v29 = vrot.slane %v161_v28, 4 }
 0x16d   :  { %v163_v30 = vadd.f32 %v162_v29, %v161_v28 }
 0x16f   :  { %v164_v31 = vrot.slane %v163_v30, 2 }
 0x171   :  { %v165_v32 = vadd.f32 %v164_v31, %v163_v30 }
 0x173   :  { %v166_v33 = vrot.slane %v165_v32, 1 }
 0x175   :  { %v167_v34 = vadd.f32 %v166_v33, %v165_v32 }
 0x177   :  { %v169_v35 = vmul.f32 0.5, %v167_v34 }
 0x179   :  { %v170_v36 = vsub.f32 %v157_v26, %v169_v35 }
 0x17b   :  { %v171_v37 = vmul.f32 %v170_v36, %v170_v36 }
 0x17d   :  { %v172_v38 = vsel %vm160_vm5, %v171_v37, 0.0 }
 0x17e   :  { %v173_v39 = vrot.slane %v172_v38, 4 }
 0x180   :  { %v174_v40 = vadd.f32 %v173_v39, %v172_v38 }
 0x182   :  { %v175_v41 = vrot.slane %v174_v40, 2 }
 0x184   :  { %v176_v42 = vadd.f32 %v175_v41, %v174_v40 }
 0x186   :  { %v177_v43 = vrot.slane %v176_v42, 1 }
 0x188   :  { %v178_v44 = vadd.f32 %v177_v43, %v176_v42 }
 0x18a   :  { %v179_v45 = vmul.f32 0.5, %v178_v44 }
 0x18c   :  { %v180_v46 = vadd.f32 1e-05, %v179_v45 }
 0x18e   :  { %370 = vrsqrt.f32 %v180_v46 }
 0x19b   :  { %v371_v47 = vpop.eup %370 }
 0x19c   :  { %v182_v49 = vmul.f32 %v371_v47, %v170_v36 }
 0x19e   :  { %v190_v51 = vmul.f32 %v342_v48, %v182_v49 }
 0x1a0   :  { %v198_v52 = vadd.f32 %v343_v50, %v190_v51 }
 0x1a2   :  { %v199_v53 = vmax.f32 %v198_v52, 0.0 }
 0x1a4   :  { %359 = vmatmul.mubr.msk.f32.vlgmr.msra.gmra.mxu1 %vm208_vm6, %v199_v53 }
 0x264   :  { %v282_v56 = vpop.f32.mrf.mxu1 }
 0x265   :  { %v283_v57 = vadd.f32 %v344_v54, %v282_v56 }
 0x266   :  { %v360_v58 = vpop.f32.mrf.mxu1 }
 0x267   :  { %v289_v59 = vrot.slane %v283_v57, %v288_v55  ;;  %v296_v61 = vrot.slane %v283_v57, %v295_v60 }
 0x269   :  { %291 = vbcast.lane.b32.xlu1 %v289_v59, 256 }
 0x26d   :  { %298 = vbcast.lane.b32.xlu1 %v296_v61, 256 }
 0x2db   :  { %v292_v4 = vpop.permute.xlu1 %291 }
 0x2dc   :  { %v308_v5 = vrot.slane %v292_v4, %v307_v3 }
 0x2de   :  { %v318_v6 = vmul.f32 %v308_v5, %v469_v0 }
 0x2df   :  { %v299_v7 = vpop.permute.xlu1 %298 }
 0x2e0   :  { %320 = vst [vmem:[#allocation5] sm:$0xff] %v318_v6  ;;  %v315_v8 = vrot.slane %v299_v7, %v307_v3 }
 0x2e2   :  { %v319_v9 = vmul.f32 %v315_v8, %v471_v1 }
 0x2e4   :  { %321 = vst [vmem:[#allocation5 + $0x8] sm:$0xff] %v319_v9 }
 0x2e5   :  { %403 = shalt.err (!%p400_p9)
}
 0x2e6   :  { %333 = dma.vmem_to_hbm [thread:$0]  %s328_s4, 256, %s517_s7, [#allocation4], %s417_s27, %s417_s27, %s418_s28  }
 0x2e7   :  { %414 = dma.done.wait [#allocation4], 256  }
 0x2e8   :  { %415 = vsyncadd [#allocation4], 4294967040 }
 0x2e9   :  { %337 = vsyncpa [#allocation3], 1 }
 0x2ea   :  { %338 = vsyncpa [#allocation4], 1 }

</bundles_post_ra>
